<compile_context>
chip_gen: v5e
topology: v5e:2x2
jax: 0.10.0
libtpu: 0.0.40
codegen_flags: <defaults>
</compile_context>

<pallas_src>
import jax
import jax.numpy as jnp
from jax.experimental import pallas as pl
from jax.experimental.pallas import tpu as pltpu


def _wsddn_kernel(x_ref, w1_ref, b1_ref, w2_ref, b2_ref, wc_ref, bc_ref,
                  out_ref):
    # x: (TN, D) tile of flattened RoI features.
    x = x_ref[...]

    # fc1 + ReLU   (dropout1 == identity at inference)
    h = jnp.dot(x, w1_ref[...], preferred_element_type=jnp.float32) + b1_ref[...]
    h = jnp.maximum(h, 0.0)

    # fc2 + ReLU   (dropout2 == identity at inference)
    h = jnp.dot(h, w2_ref[...], preferred_element_type=jnp.float32) + b2_ref[...]
    h = jnp.maximum(h, 0.0)

    # fused classification + detection heads: (TN, 2*num_classes)
    out = jnp.dot(h, wc_ref[...], preferred_element_type=jnp.float32) + bc_ref[...]
    out_ref[...] = out.astype(out_ref.dtype)


def wsddn_head_forward(x, params, *, tile_n=512):
    """x: (N, C, H, W) float32 RoI features.  Returns (cls1, cls2)."""
    n = x.shape[0]
    x_flat = x.reshape(n, -1)  # glue: identical to PyTorch x.view(N, -1)
    d = x_flat.shape[1]

    w1, b1, w2, b2, wc1, bc1, wc2, bc2 = params
    hidden = w1.shape[1]
    num_classes = wc1.shape[1]

    # Fuse the two heads into a single matmul (split again after the kernel).
    wc = jnp.concatenate([wc1, wc2], axis=1)   # (hidden, 2*num_classes)
    bc = jnp.concatenate([bc1, bc2], axis=1)   # (1, 2*num_classes)
    c2 = 2 * num_classes

    # Tile size over the RoI axis: multiple of 8 (sublane) unless N is tiny,
    # in which case a single full-extent block is used.
    if n <= 8:
        tn = n
        n_pad = n
    else:
        tn = min(tile_n, n)
        tn = max(8, (tn // 8) * 8)
        n_pad = pl.cdiv(n, tn) * tn
    if n_pad != n:
        # Pad rows so the grid divides evenly; padded rows are sliced off.
        x_flat = jnp.pad(x_flat, ((0, n_pad - n), (0, 0)))
    grid = (n_pad // tn,)

    flops = 2 * n_pad * (d * hidden + hidden * hidden + hidden * c2)
    bytes_accessed = 4 * (x_flat.size + w1.size + b1.size + w2.size + b2.size
                          + wc.size + bc.size + n_pad * c2)

    out = pl.pallas_call(
        _wsddn_kernel,
        out_shape=jax.ShapeDtypeStruct((n_pad, c2), jnp.float32),
        grid=grid,
        in_specs=[
            # x tile marches over the RoI axis.
            pl.BlockSpec((tn, d), lambda i: (i, 0)),
            # weights / biases stay VMEM-resident across all grid steps.
            pl.BlockSpec(w1.shape, lambda i: (0, 0)),
            pl.BlockSpec(b1.shape, lambda i: (0, 0)),
            pl.BlockSpec(w2.shape, lambda i: (0, 0)),
            pl.BlockSpec(b2.shape, lambda i: (0, 0)),
            pl.BlockSpec(wc.shape, lambda i: (0, 0)),
            pl.BlockSpec(bc.shape, lambda i: (0, 0)),
        ],
        out_specs=pl.BlockSpec((tn, c2), lambda i: (i, 0)),
        compiler_params=pltpu.CompilerParams(
            dimension_semantics=("parallel",)),
        cost_estimate=pl.CostEstimate(
            flops=flops, transcendentals=0, bytes_accessed=bytes_accessed),
    )(x_flat, w1, b1, w2, b2, wc, bc)

    out = out[:n]
    return out[:, :num_classes], out[:, num_classes:]


def init_wsddn_params(key, roi_feat_size=7, in_channels=4,
                      hidden_channels=32, num_classes=20):
    """Deterministic init mirroring WSDDNHead.init_weights():
       weights ~ N(0, 0.01), biases = 0.  Weights stored as (in, out)."""
    d = in_channels * roi_feat_size * roi_feat_size
    k1, k2, k3, k4 = jax.random.split(key, 4)
    std = 0.01
    w1 = std * jax.random.normal(k1, (d, hidden_channels), jnp.float32)
    b1 = jnp.zeros((1, hidden_channels), jnp.float32)
    w2 = std * jax.random.normal(k2, (hidden_channels, hidden_channels), jnp.float32)
    b2 = jnp.zeros((1, hidden_channels), jnp.float32)
    wc1 = std * jax.random.normal(k3, (hidden_channels, num_classes), jnp.float32)
    bc1 = jnp.zeros((1, num_classes), jnp.float32)
    wc2 = std * jax.random.normal(k4, (hidden_channels, num_classes), jnp.float32)
    bc2 = jnp.zeros((1, num_classes), jnp.float32)
    return (w1, b1, w2, b2, wc1, bc1, wc2, bc2)


if __name__ == "__main__":
    key = jax.random.PRNGKey(0)
    k_x, k_p = jax.random.split(key)

    # Small shapes consistent with the module: N RoIs of (C, 7, 7) features.
    # N=50 is deliberately not a multiple of the tile to exercise padding,
    # and tile_n=16 gives a multi-step grid (pipelined).
    num_rois, in_channels, roi_feat_size = 50, 4, 7
    hidden_channels, num_classes = 32, 20

    x = jax.random.normal(
        k_x, (num_rois, in_channels, roi_feat_size, roi_feat_size), jnp.float32)
    params = init_wsddn_params(
        k_p, roi_feat_size=roi_feat_size, in_channels=in_channels,
        hidden_channels=hidden_channels, num_classes=num_classes)

    cls1, cls2 = wsddn_head_forward(x, params, tile_n=16)
    jax.block_until_ready((cls1, cls2))

    # Pure-JAX reference check of the same forward semantics.
    w1, b1, w2, b2, wc1, bc1, wc2, bc2 = params
    xf = x.reshape(num_rois, -1)
    h = jnp.maximum(xf @ w1 + b1, 0.0)
    h = jnp.maximum(h @ w2 + b2, 0.0)
    ref1 = h @ wc1 + bc1
    ref2 = h @ wc2 + bc2
    assert cls1.shape == (num_rois, num_classes)
    assert cls2.shape == (num_rois, num_classes)
    assert jnp.allclose(cls1, ref1, atol=1e-5, rtol=1e-5)
    assert jnp.allclose(cls2, ref2, atol=1e-5, rtol=1e-5)

    print("KERNEL_OK")
</pallas_src>

<mosaic_0001>
module attributes {stable_mosaic.version = 11 : i64} {
  func.func @_wsddn_kernel(%arg0: i32, %arg1: memref<16x196xf32, #tpu.memory_space<vmem>>, %arg2: memref<196x32xf32, #tpu.memory_space<vmem>>, %arg3: memref<1x32xf32, #tpu.memory_space<vmem>>, %arg4: memref<32x32xf32, #tpu.memory_space<vmem>>, %arg5: memref<1x32xf32, #tpu.memory_space<vmem>>, %arg6: memref<32x40xf32, #tpu.memory_space<vmem>>, %arg7: memref<1x40xf32, #tpu.memory_space<vmem>>, %arg8: memref<16x40xf32, #tpu.memory_space<vmem>>) attributes {dimension_semantics = [#tpu.dimension_semantics<parallel>], iteration_bounds = array<i64: 4>, scalar_prefetch = 0 : i64, scratch_operands = 0 : i64, tpu.core_type = #tpu.core_type<tc>, window_params = [{transform_indices = @transform_0, window_bounds = array<i64: 16, 196>}, {pipeline_mode = #tpu.pipeline_mode<synchronous>, transform_indices = @transform_1, window_bounds = array<i64: 196, 32>}, {pipeline_mode = #tpu.pipeline_mode<synchronous>, transform_indices = @transform_2, window_bounds = array<i64: 1, 32>}, {pipeline_mode = #tpu.pipeline_mode<synchronous>, transform_indices = @transform_3, window_bounds = array<i64: 32, 32>}, {pipeline_mode = #tpu.pipeline_mode<synchronous>, transform_indices = @transform_4, window_bounds = array<i64: 1, 32>}, {pipeline_mode = #tpu.pipeline_mode<synchronous>, transform_indices = @transform_5, window_bounds = array<i64: 32, 40>}, {pipeline_mode = #tpu.pipeline_mode<synchronous>, transform_indices = @transform_6, window_bounds = array<i64: 1, 40>}, {transform_indices = @transform_7, window_bounds = array<i64: 16, 40>}]} {
    %c0 = arith.constant 0 : index
    %c0_0 = arith.constant 0 : index
    %0 = vector.load %arg1[%c0, %c0_0] : memref<16x196xf32, #tpu.memory_space<vmem>>, vector<16x196xf32>
    %c0_1 = arith.constant 0 : index
    %c0_2 = arith.constant 0 : index
    %1 = vector.load %arg2[%c0_1, %c0_2] : memref<196x32xf32, #tpu.memory_space<vmem>>, vector<196x32xf32>
    %cst = arith.constant dense<0.000000e+00> : vector<16x32xf32>
    %2 = tpu.matmul %0, %1, %cst {dimension_numbers = #tpu.dot_dimension_numbers<[1], [0], [0], [1], [0, 0, 1, 1], [], []>} : vector<16x196xf32>, vector<196x32xf32>, vector<16x32xf32> -> vector<16x32xf32>
    %c0_3 = arith.constant 0 : index
    %c0_4 = arith.constant 0 : index
    %3 = vector.load %arg3[%c0_3, %c0_4] : memref<1x32xf32, #tpu.memory_space<vmem>>, vector<1x32xf32>
    %4 = vector.broadcast %3 : vector<1x32xf32> to vector<16x32xf32>
    %5 = arith.addf %2, %4 : vector<16x32xf32>
    %cst_5 = arith.constant 0.000000e+00 : f32
    %6 = vector.broadcast %cst_5 : f32 to vector<16x32xf32>
    %7 = arith.maximumf %5, %6 : vector<16x32xf32>
    %c0_6 = arith.constant 0 : index
    %c0_7 = arith.constant 0 : index
    %8 = vector.load %arg4[%c0_6, %c0_7] : memref<32x32xf32, #tpu.memory_space<vmem>>, vector<32x32xf32>
    %cst_8 = arith.constant dense<0.000000e+00> : vector<16x32xf32>
    %9 = tpu.matmul %7, %8, %cst_8 {dimension_numbers = #tpu.dot_dimension_numbers<[1], [0], [0], [1], [0, 0, 1, 1], [], []>} : vector<16x32xf32>, vector<32x32xf32>, vector<16x32xf32> -> vector<16x32xf32>
    %c0_9 = arith.constant 0 : index
    %c0_10 = arith.constant 0 : index
    %10 = vector.load %arg5[%c0_9, %c0_10] : memref<1x32xf32, #tpu.memory_space<vmem>>, vector<1x32xf32>
    %11 = vector.broadcast %10 : vector<1x32xf32> to vector<16x32xf32>
    %12 = arith.addf %9, %11 : vector<16x32xf32>
    %cst_11 = arith.constant 0.000000e+00 : f32
    %13 = vector.broadcast %cst_11 : f32 to vector<16x32xf32>
    %14 = arith.maximumf %12, %13 : vector<16x32xf32>
    %c0_12 = arith.constant 0 : index
    %c0_13 = arith.constant 0 : index
    %15 = vector.load %arg6[%c0_12, %c0_13] : memref<32x40xf32, #tpu.memory_space<vmem>>, vector<32x40xf32>
    %cst_14 = arith.constant dense<0.000000e+00> : vector<16x40xf32>
    %16 = tpu.matmul %14, %15, %cst_14 {dimension_numbers = #tpu.dot_dimension_numbers<[1], [0], [0], [1], [0, 0, 1, 1], [], []>} : vector<16x32xf32>, vector<32x40xf32>, vector<16x40xf32> -> vector<16x40xf32>
    %c0_15 = arith.constant 0 : index
    %c0_16 = arith.constant 0 : index
    %17 = vector.load %arg7[%c0_15, %c0_16] : memref<1x40xf32, #tpu.memory_space<vmem>>, vector<1x40xf32>
    %18 = vector.broadcast %17 : vector<1x40xf32> to vector<16x40xf32>
    %19 = arith.addf %16, %18 : vector<16x40xf32>
    %c0_17 = arith.constant 0 : index
    %c0_18 = arith.constant 0 : index
    %20 = vector.load %arg8[%c0_17, %c0_18] : memref<16x40xf32, #tpu.memory_space<vmem>>, vector<16x40xf32>
    tpu.vector_store %arg8[%c0_17, %c0_18], %19 {strides = array<i32>} : memref<16x40xf32, #tpu.memory_space<vmem>>, vector<16x40xf32>,
    return
  }
  func.func @transform_0(%arg0: i32) -> (i32, i32) {
    %c0_i32 = arith.constant 0 : i32
    %c0_i32_0 = arith.constant 0 : i32
    return %arg0, %c0_i32 : i32, i32
  }
  func.func @transform_1(%arg0: i32) -> (i32, i32) {
    %c0_i32 = arith.constant 0 : i32
    %c0_i32_0 = arith.constant 0 : i32
    %c0_i32_1 = arith.constant 0 : i32
    return %c0_i32, %c0_i32_0 : i32, i32
  }
  func.func @transform_2(%arg0: i32) -> (i32, i32) {
    %c0_i32 = arith.constant 0 : i32
    %c0_i32_0 = arith.constant 0 : i32
    %c0_i32_1 = arith.constant 0 : i32
    return %c0_i32, %c0_i32_0 : i32, i32
  }
  func.func @transform_3(%arg0: i32) -> (i32, i32) {
    %c0_i32 = arith.constant 0 : i32
    %c0_i32_0 = arith.constant 0 : i32
    %c0_i32_1 = arith.constant 0 : i32
    return %c0_i32, %c0_i32_0 : i32, i32
  }
  func.func @transform_4(%arg0: i32) -> (i32, i32) {
    %c0_i32 = arith.constant 0 : i32
    %c0_i32_0 = arith.constant 0 : i32
    %c0_i32_1 = arith.constant 0 : i32
    return %c0_i32, %c0_i32_0 : i32, i32
  }
  func.func @transform_5(%arg0: i32) -> (i32, i32) {
    %c0_i32 = arith.constant 0 : i32
    %c0_i32_0 = arith.constant 0 : i32
    %c0_i32_1 = arith.constant 0 : i32
    return %c0_i32, %c0_i32_0 : i32, i32
  }
  func.func @transform_6(%arg0: i32) -> (i32, i32) {
    %c0_i32 = arith.constant 0 : i32
    %c0_i32_0 = arith.constant 0 : i32
    %c0_i32_1 = arith.constant 0 : i32
    return %c0_i32, %c0_i32_0 : i32, i32
  }
  func.func @transform_7(%arg0: i32) -> (i32, i32) {
    %c0_i32 = arith.constant 0 : i32
    %c0_i32_0 = arith.constant 0 : i32
    return %arg0, %c0_i32 : i32, i32
  }
}

</mosaic_0001>

<bundles_post_ra>
// kernel: tpu_custom_call.1
= control target key start
LH: loop header
LB: loop body
LE: loop exit
PB: predicated region body
PF: predicated region fallthrough
CT: control target
= control target key end

     0   :  { %s592_s24 = smov 0   ;;  %s727_s0 = inlined_call_operand.vmem [shape: f32[64,196], index: 0, kind: input, shape index: {}]   ;;  %s728_s1 = inlined_call_operand.vmem [shape: f32[196,32], index: 1, kind: input, shape index: {}]   ;;  %s729_s2 = inlined_call_operand.vmem [shape: f32[1,32], index: 2, kind: input, shape index: {}]   ;;  %s730_s3 = inlined_call_operand.vmem [shape: f32[32,32], index: 3, kind: input, shape index: {}]   ;;  %s731_s4 = inlined_call_operand.vmem [shape: f32[1,32], index: 4, kind: input, shape index: {}]   ;;  %s732_s5 = inlined_call_operand.vmem [shape: f32[32,40], index: 5, kind: input, shape index: {}]   ;;  %s733_s6 = inlined_call_operand.vmem [shape: f32[1,40], index: 6, kind: input, shape index: {}]   ;;  %s734_s7 = inlined_call_operand.vmem [shape: f32[64,40], index: 7, kind: output, shape index: {}]  }
   0x1 LB: > { %s513_s25 = sadd.s32 4294967295, %s550_s24   ;;  %p517_p0 = scmp.ge.s32.totalorder %s550_s24, 1  ;;  %s550_s24 = sphi %s592_s24, %s17_s24  }
   0x2   : > { %p239_p1 = scmp.lt.s32.totalorder %s550_s24, 5 }
   0x4   : > { %p240_p2 = pnand %p517_p0, %p239_p1 }
   0x5   : > { %s518_s13 = sshll.u32 (!%p240_p2), %s513_s25, 1 }
   0x6   : > { %243 = sbr.rel (%p240_p2) target bundleno = 454 (0x1c6), region = 48  ;;  %p273_p3 = scmp.lt.s32.totalorder (!%p240_p2), %s518_s13, 7 }
   0xb   : > { %v304_v0 = vld [vmem:[%s728_s1 + $0x78] sm:$0xff]  ;;  %v303_v1 = vld [vmem:[%s728_s1 + $0x70] sm:$0xff]  ;;  %vm325_vm0 = vcmask 1043456   ;;  %v302_v2 = vld [vmem:[%s728_s1 + $0x68] sm:$0xff]  ;;  %s736_s13 = smov (!%p273_p3, %s518_s13), 7  ;;  %vm318_vm1 = vcmask 556032  }
   0xc   : > { %329 = vmatpush.msra.mxu0 %v304_v0  ;;  %v313_v3 = vld [vmem:[%s728_s1 + $0xc0] sm:$0xf]  ;;  %v312_v4 = vld [vmem:[%s728_s1 + $0xb8] sm:$0xff]  ;;  %v311_v6 = vld [vmem:[%s728_s1 + $0xb0] sm:$0xff]  ;;  %s532_s15 = sshll.u32 %s736_s13, 4  ;;  %vm385_vm2 = vcmask 261120  }
   0xd   : > { %v301_v5 = vld [vmem:[%s728_s1 + $0x60] sm:$0xff]  ;;  %523 = vmatpush.msk.msra.mxu1 %vm325_vm0, %v313_v3  ;;  %v300_v7 = vld [vmem:[%s728_s1 + $0x58] sm:$0xff]  ;;  %v310_v8 = vld [vmem:[%s728_s1 + $0xa8] sm:$0xff]  ;;  %s277_s22 = scalar_lea.vmem %s727_s0, %s532_s15  ;;  %s522_s15 = sshll.u32 %s736_s13, 3  ;;  %vm454_vm3 = vcmask 326656  }
   0xe   : > { %330 = vmatpush.msra.mxu0 %v303_v1  ;;  %v299_v9 = vld [vmem:[%s728_s1 + $0x50] sm:$0xff]  ;;  %v309_v10 = vld [vmem:[%s728_s1 + $0xa0] sm:$0xff]  ;;  %v298_v11 = vld [vmem:[%s728_s1 + $0x48] sm:$0xff]  ;;  %s283_s20 = scalar_lea.vmem %s734_s7, %s522_s15 }
   0xf   : > { %360 = vmatpush.msra.mxu1 %v312_v4  ;;  %v308_v12 = vld [vmem:[%s728_s1 + $0x98] sm:$0xff]  ;;  %v297_v13 = vld [vmem:[%s728_s1 + $0x40] sm:$0xff]  ;;  %v307_v14 = vld [vmem:[%s728_s1 + $0x90] sm:$0xff] }
  0x10   : > { %331 = vmatpush.msra.mxu0 %v302_v2  ;;  %v296_v15 = vld [vmem:[%s728_s1 + $0x38] sm:$0xff]  ;;  %v306_v16 = vld [vmem:[%s728_s1 + $0x88] sm:$0xff]  ;;  %v295_v17 = vld [vmem:[%s728_s1 + $0x30] sm:$0xff] }
  0x11   : > { %361 = vmatpush.msra.mxu1 %v311_v6  ;;  %v305_v18 = vld [vmem:[%s728_s1 + $0x80] sm:$0xff]  ;;  %v294_v19 = vld [vmem:[%s728_s1 + $0x28] sm:$0xff]  ;;  %v292_v22 = vld [vmem:[%s728_s1 + $0x18] sm:$0xff] }
  0x12   : > { %332 = vmatpush.msra.mxu0 %v301_v5  ;;  %v286_v20 = vld [vmem:[%s277_s22 + $0x8] sm:$0xff]  ;;  %v293_v21 = vld [vmem:[%s728_s1 + $0x20] sm:$0xff]  ;;  %v291_v23 = vld [vmem:[%s728_s1 + $0x10] sm:$0xff] }
  0x13   : > { %362 = vmatpush.msra.mxu1 %v310_v8  ;;  %v290_v24 = vld [vmem:[%s728_s1 + $0x8] sm:$0xff]  ;;  %v288_v25 = vld [vmem:[%s277_s22 + $0x18] sm:$0xff]  ;;  %v289_v26 = vld [vmem:[%s728_s1] sm:$0xff] }
  0x14   : > { %333 = vmatpush.msra.mxu0 %v300_v7  ;;  %v285_v27 = vld [vmem:[%s277_s22] sm:$0xff]  ;;  %v287_v28 = vld [vmem:[%s277_s22 + $0x10] sm:$0xff]  ;;  %v380_v29 = vld [vmem:[%s730_s3 + $0x18] sm:$0xff] }
  0x15   : > { %363 = vmatpush.msra.mxu1 %v309_v10  ;;  %404 = vmatpush.msra.mxu2 %v380_v29  ;;  %v379_v30 = vld [vmem:[%s730_s3 + $0x10] sm:$0xff]  ;;  %v378_v31 = vld [vmem:[%s730_s3 + $0x8] sm:$0xff]  ;;  %v377_v32 = vld [vmem:[%s730_s3] sm:$0xff] }
  0x16   : > { %334 = vmatpush.msra.mxu0 %v299_v9  ;;  %v420_v33 = vld [vmem:[%s732_s5 + $0x18] sm:$0xff]  ;;  %v541_v34 = vld [vmem:[%s729_s2] ss:$0 sm:$0xff]  ;;  %v419_v45 = vld [vmem:[%s732_s5 + $0x10] sm:$0xff] }
  0x17   : > { %364 = vmatpush.msra.mxu1 %v308_v12  ;;  %405 = vmatpush.msra.mxu2 %v379_v30  ;;  %v418_v46 = vld [vmem:[%s732_s5 + $0x8] sm:$0xff]  ;;  %v417_v47 = vld [vmem:[%s732_s5] sm:$0xff] }
  0x18   : > { %335 = vmatpush.msra.mxu0 %v298_v11  ;;  %443 = vmatpush.msra.mxu3 %v420_v33  ;;  %v542_v48 = vld [vmem:[%s731_s4] ss:$0 sm:$0xff] }
  0x19   : > { %365 = vmatpush.msra.mxu1 %v307_v14  ;;  %406 = vmatpush.msra.mxu2 %v378_v31  ;;  %v543_v55 = vld [vmem:[%s733_s6] ss:$0 sm:$0xff] }
  0x1a   : > { %336 = vmatpush.msra.mxu0 %v297_v13  ;;  %444 = vmatpush.msra.mxu3 %v419_v45 }
  0x1b   : > { %366 = vmatpush.msra.mxu1 %v306_v16  ;;  %407 = vmatpush.msra.mxu2 %v377_v32 }
  0x1c   : > { %337 = vmatpush.msra.mxu0 %v296_v15  ;;  %445 = vmatpush.msra.mxu3 %v418_v46 }
  0x1d   : > { %367 = vmatpush.msra.mxu1 %v305_v18 }
  0x1e   : > { %338 = vmatpush.msra.mxu0 %v295_v17  ;;  %524 = vmatmul.msk.f32.vlgmr.msra.gmra.mxu1 %vm318_vm1, %v286_v20 }
  0x1f   : > { %446 = vmatpush.msra.mxu3 %v417_v47 }
  0x20   : > { %339 = vmatpush.msra.mxu0 %v294_v19 }
  0x22   : > { %340 = vmatpush.msra.mxu0 %v293_v21 }
  0x24   : > { %341 = vmatpush.msra.mxu0 %v292_v22 }
  0x26   : > { %342 = vmatpush.msra.mxu0 %v291_v23  ;;  %525 = vmatmul.msk.f32.gmra.mxu1 %vm318_vm1, %v288_v25 }
  0x28   : > { %343 = vmatpush.msra.mxu0 %v290_v24 }
  0x2a   : > { %344 = vmatpush.msra.mxu0 %v289_v26 }
  0x2b   : > { %345 = vmatmul.f32.vlgmr.msra.gmra.mxu0 %v285_v27 }
  0x33   : > { %348 = vmatmul.f32.gmra.mxu0 %v287_v28 }
  0x9b   : > { %v369_v35 = vpop.f32.mrf.mxu1 }
  0xa3   : > { %v372_v41 = vpop.f32.mrf.mxu1 }
  0xa8   : > { %v346_v36 = vpop.f32.mrf.mxu0 }
  0xa9   : > { %v347_v37 = vadd.f32 %v541_v34, %v346_v36 }
  0xab   : > { %v370_v38 = vadd.f32 %v369_v35, %v347_v37 }
  0xad   : > { %v375_v39 = vmax.f32 %v370_v38, 0.0 }
  0xaf   : > { %526 = vmatmul.msk.f32.vlgmr.msra.gmra.mxu2 %vm385_vm2, %v375_v39 }
  0xb0   : > { %v349_v40 = vpop.f32.mrf.mxu0 }
  0xb1   : > { %v350_v42 = vadd.f32 %v541_v34, %v349_v40 }
  0xb3   : > { %v373_v43 = vadd.f32 %v372_v41, %v350_v42 }
  0xb5   : > { %v376_v44 = vmax.f32 %v373_v43, 0.0 }
  0xb7   : > { %527 = vmatmul.msk.f32.gmra.mxu2 %vm385_vm2, %v376_v44 }
 0x132   : > { %v409_v49 = vpop.f32.mrf.mxu2 }
 0x133   : > { %v410_v50 = vadd.f32 %v542_v48, %v409_v49 }
 0x135   : > { %v415_v51 = vmax.f32 %v410_v50, 0.0 }
 0x137   : > { %528 = vmatmul.msk.f32.vlgmr.msra.gmra.mxu3 %vm385_vm2, %v415_v51 }
 0x13a   : > { %v412_v52 = vpop.f32.mrf.mxu2 }
 0x13b   : > { %v413_v53 = vadd.f32 %v542_v48, %v412_v52 }
 0x13d   : > { %v416_v54 = vmax.f32 %v413_v53, 0.0 }
 0x13f   : > { %529 = vmatmul.msk.f32.gmra.mxu3 %vm385_vm2, %v416_v54 }
 0x1ba   : > { %v448_v56 = vpop.f32.mrf.mxu3 }
 0x1bb   : > { %v449_v57 = vadd.f32 %v543_v55, %v448_v56 }
 0x1bd   : > { %455 = vst.msk [vmem:[%s283_s20] sm:$0xff] %vm454_vm3, %v449_v57 }
 0x1c2   : > { %v451_v58 = vpop.f32.mrf.mxu3 }
 0x1c3   : > { %v452_v59 = vadd.f32 %v543_v55, %v451_v58 }
 0x1c5   : > { %456 = vst.msk [vmem:[%s283_s20 + $0x8] sm:$0xff] %vm454_vm3, %v452_v59 }
 0x1c6 PF: > { %s17_s24 = sadd.s32 1, %s550_s24  }
 0x1c7   : > { %p14_p4 = scmp.ge.s32.totalorder %s17_s24, 6  }
 0x1c9   :  { %16 = sbr.rel (!%p14_p4) target bundleno = 1 (0x1), region = 78 }

</bundles_post_ra>
